<compile_context>
chip_gen: v6e
topology: v6e:2x2x1
jax: 0.10.0
libtpu: 0.0.40
codegen_flags: <defaults>
</compile_context>

<pallas_src>
import jax
import jax.numpy as jnp
from jax.experimental import pallas as pl
from jax.experimental.pallas import tpu as pltpu

_LANE = 128


def _scope_kernel(hs_ref, is_ref, w1_ref, b1_ref, w2_ref, b2_ref, o_ref):
    # hs_ref / is_ref : (bb*S, H)  row-flattened block of `bb` batch elements
    # w*_ref          : (H, H)     pre-transposed (in_features, out_features), bf16
    # b*_ref          : (1, H)     f32 (W1 bias already carries the 1/sqrt(H) scale)
    # o_ref           : (bb, S, S) scaled attention scores for this batch block
    bb, S, _ = o_ref.shape
    H = hs_ref.shape[-1]

    hs_f32 = hs_ref[...].astype(jnp.float32)
    xs_f32 = hs_f32 + is_ref[...].astype(jnp.float32)      # hs + Is (f32 add)

    # Feed the MXU bf16 operands, accumulate in f32.
    hs = hs_f32.astype(jnp.bfloat16)
    xs = xs_f32.astype(jnp.bfloat16)

    w1 = jnp.dot(hs, w1_ref[...], preferred_element_type=jnp.float32) + b1_ref[...]
    w2 = jnp.dot(xs, w2_ref[...], preferred_element_type=jnp.float32) + b2_ref[...]

    # S is a multiple of 128 (wrapper pads), so these reshapes never cross a
    # (8,128)/(16,128) tile boundary -> layout no-ops.
    w1 = w1.astype(jnp.bfloat16).reshape(bb, S, H)
    w2 = w2.astype(jnp.bfloat16).reshape(bb, S, H)

    # attn[b] = w1[b] @ w2[b]^T ; the 1/sqrt(H) scale is folded into W1/b1.
    attn = jnp.einsum("bih,bjh->bij", w1, w2, preferred_element_type=jnp.float32)
    o_ref[...] = attn.astype(o_ref.dtype)


def _round_up(x, m):
    return (x + m - 1) // m * m


def _vmem_capacity_bytes():
    # Generation-aware: 128 MiB on v5e/v6e, 64 MiB per TensorCore on v7x.
    try:
        return int(pltpu.get_tpu_info().vmem_capacity_bytes)
    except Exception:
        return 64 * 1024 * 1024  # conservative (v7x-sized) fallback


def _pick_batch_block(B, S, H, itemsize, vmem_budget):
    """Largest divisor `bb` of B whose per-step VMEM working set fits the
    budget. Keeps grid length >= 2 when B >= 2 so both v7x TensorCores get
    work from the "parallel" batch axis."""
    # Grid-invariant blocks: two bf16 (H,H) weights + two f32 (1,H) biases.
    # Counted double-buffered, in case single-buffering is not honored.
    fixed = 2 * (2 * H * H * 2) + 2 * (2 * H * 4)
    best = 1
    for bb in range(1, B + 1):
        if B % bb:
            continue
        if B >= 2 and B // bb < 2:
            continue  # keep >= 2 grid steps (v7x megacore utilization)
        rows = bb * S
        io = (2 * (2 * rows * H * itemsize)        # hs, Is blocks, double-buffered
              + 2 * (bb * S * S * itemsize))       # output block, double-buffered
        temps = (2 * rows * H * 2                  # bf16 hs, xs
                 + 2 * rows * H * 4                # f32 w1, w2 accumulators
                 + 2 * rows * H * 2                # bf16 w1, w2 for score matmul
                 + bb * S * S * 4)                 # f32 attn before the store
        if fixed + io + temps <= vmem_budget:
            best = bb
    return best


def _build_call(*, B, S_pad, H, bb, dtype, vmem_limit, flops, bytes_accessed,
                single_buffer_weights):
    row_spec = pl.BlockSpec((bb * S_pad, H), lambda i: (i, 0))
    out_spec = pl.BlockSpec((bb, S_pad, S_pad), lambda i: (i, 0, 0))

    def const_spec(shape):
        idx = lambda i: (0,) * len(shape)
        if single_buffer_weights:
            # Grid-invariant operands: one VMEM buffer is enough -> saves
            # 2*H*H bf16 bytes of VMEM, buying a larger batch block.
            return pl.BlockSpec(shape, idx, pipeline_mode=pl.Buffered(1))
        return pl.BlockSpec(shape, idx)

    w_spec = const_spec((H, H))
    b_spec = const_spec((1, H))

    return pl.pallas_call(
        _scope_kernel,
        out_shape=jax.ShapeDtypeStruct((B, S_pad, S_pad), dtype),
        grid_spec=pltpu.PrefetchScalarGridSpec(
            num_scalar_prefetch=0,
            grid=(B // bb,),
            in_specs=[row_spec, row_spec, w_spec, b_spec, w_spec, b_spec],
            out_specs=out_spec,
        ),
        compiler_params=pltpu.CompilerParams(
            dimension_semantics=("parallel",),
            vmem_limit_bytes=vmem_limit,
        ),
        cost_estimate=pl.CostEstimate(
            flops=flops, transcendentals=0, bytes_accessed=bytes_accessed),
    )


def scope_recognizer_pallas(hs, Is, W1, b1, W2, b2):
    B, S, H = hs.shape
    assert Is.shape == (B, S, H)
    assert W1.shape == (H, H) and W2.shape == (H, H)

    out_dtype = hs.dtype
    itemsize = jnp.dtype(out_dtype).itemsize

    # Fold 1/sqrt(H) into W1/b1 (free; removes an O(S^2) VALU pass), pre-
    # transpose both weights to (in, out) layout, and cast them bf16 for MXU.
    scale = 1.0 / (float(H) ** 0.5)
    W1t = (W1.astype(jnp.float32) * scale).T.astype(jnp.bfloat16)
    W2t = W2.astype(jnp.float32).T.astype(jnp.bfloat16)
    b1s = (b1.astype(jnp.float32) * scale).reshape(1, H)
    b2r = b2.astype(jnp.float32).reshape(1, H)

    # Pad S to a multiple of 128: lane-dense output stores, MXU-width-aligned
    # score matmul, sublane-aligned in-kernel reshapes. Padded rows are zeros;
    # H (the only contraction dim) is untouched so real outputs are exact.
    S_pad = _round_up(S, _LANE)
    if S_pad != S:
        pad = ((0, 0), (0, S_pad - S), (0, 0))
        hs_p = jnp.pad(hs, pad)
        Is_p = jnp.pad(Is, pad)
    else:
        hs_p, Is_p = hs, Is

    # Row-flatten so each grid step runs one fat (bb*S, H) @ (H, H) projection.
    hs2 = hs_p.reshape(B * S_pad, H)
    Is2 = Is_p.reshape(B * S_pad, H)

    vmem_phys = _vmem_capacity_bytes()
    vmem_budget = int(vmem_phys * 0.65)   # ~42 MiB on v7x, ~83 MiB on v5e/v6e
    vmem_limit = int(vmem_phys * 0.90)    # raise scoped limit (v5e default 16 MiB)

    bb = _pick_batch_block(B, S_pad, H, itemsize, vmem_budget)

    flops = 4 * B * S_pad * H * H + 2 * B * S_pad * S_pad * H
    bytes_accessed = (2 * B * S_pad * H * itemsize       # hs, Is
                      + 2 * H * H * 2 + 2 * H * 4        # weights + biases
                      + B * S_pad * S_pad * itemsize)    # scores

    args = (hs2, Is2, W1t, b1s, W2t, b2r)
    call_kwargs = dict(B=B, S_pad=S_pad, H=H, bb=bb, dtype=out_dtype,
                       vmem_limit=vmem_limit, flops=flops,
                       bytes_accessed=bytes_accessed)
    try:
        out = _build_call(single_buffer_weights=True, **call_kwargs)(*args)
        out = jax.block_until_ready(out)
    except Exception:
        # pipeline_mode=pl.Buffered(1) not supported by this runtime: fall back
        # to default double-buffering of the (grid-invariant) weights/biases.
        out = _build_call(single_buffer_weights=False, **call_kwargs)(*args)

    if S_pad != S:
        out = out[:, :S, :S]
    return out


def scope_recognizer_ref(hs, Is, W1, b1, W2, b2):
    H = W1.shape[0]
    w1 = jnp.einsum("bsh,oh->bso", hs, W1) + b1
    w2 = jnp.einsum("bsh,oh->bso", hs + Is, W2) + b2
    return jnp.einsum("bih,bjh->bij", w1, w2) / (float(H) ** 0.5)


if __name__ == "__main__":
    B, S, H = 2, 8, 32
    key = jax.random.PRNGKey(0)
    khs, kis, kw1, kb1, kw2, kb2 = jax.random.split(key, 6)

    hs = jax.random.normal(khs, (B, S, H), dtype=jnp.float32)
    Is = jax.random.normal(kis, (B, S, H), dtype=jnp.float32)

    # PyTorch Linear-style uniform init.
    bound = 1.0 / (H ** 0.5)
    W1 = jax.random.uniform(kw1, (H, H), jnp.float32, -bound, bound)
    b1 = jax.random.uniform(kb1, (H,), jnp.float32, -bound, bound)
    W2 = jax.random.uniform(kw2, (H, H), jnp.float32, -bound, bound)
    b2 = jax.random.uniform(kb2, (H,), jnp.float32, -bound, bound)

    out = scope_recognizer_pallas(hs, Is, W1, b1, W2, b2)
    out = jax.block_until_ready(out)

    ref = scope_recognizer_ref(hs, Is, W1, b1, W2, b2)
    err = float(jnp.max(jnp.abs(out - ref)))
    # bf16 MXU operands with f32 accumulation -> bf16-level tolerance.
    assert jnp.allclose(out, ref, atol=5e-2, rtol=5e-2), f"max abs err = {err}"
    print("KERNEL_OK")
</pallas_src>

<mosaic_0001>
module attributes {stable_mosaic.version = 11 : i64} {
  func.func @_scope_kernel(%arg0: i32, %arg1: memref<128x32xf32, #tpu.memory_space<vmem>>, %arg2: memref<128x32xf32, #tpu.memory_space<vmem>>, %arg3: memref<32x32xbf16, #tpu.memory_space<vmem>>, %arg4: memref<1x32xf32, #tpu.memory_space<vmem>>, %arg5: memref<32x32xbf16, #tpu.memory_space<vmem>>, %arg6: memref<1x32xf32, #tpu.memory_space<vmem>>, %arg7: memref<1x128x128xf32, #tpu.memory_space<vmem>>) attributes {dimension_semantics = [#tpu.dimension_semantics<parallel>], iteration_bounds = array<i64: 2>, scalar_prefetch = 0 : i64, scratch_operands = 0 : i64, tpu.core_type = #tpu.core_type<tc>, window_params = [{transform_indices = @transform_0, window_bounds = array<i64: 128, 32>}, {transform_indices = @transform_1, window_bounds = array<i64: 128, 32>}, {pipeline_mode = #tpu.pipeline_mode<synchronous>, transform_indices = @transform_2, window_bounds = array<i64: 32, 32>}, {pipeline_mode = #tpu.pipeline_mode<synchronous>, transform_indices = @transform_3, window_bounds = array<i64: 1, 32>}, {pipeline_mode = #tpu.pipeline_mode<synchronous>, transform_indices = @transform_4, window_bounds = array<i64: 32, 32>}, {pipeline_mode = #tpu.pipeline_mode<synchronous>, transform_indices = @transform_5, window_bounds = array<i64: 1, 32>}, {transform_indices = @transform_6, window_bounds = array<i64: 1, 128, 128>}]} {
    %c0 = arith.constant 0 : index
    %c0_0 = arith.constant 0 : index
    %0 = vector.load %arg1[%c0, %c0_0] : memref<128x32xf32, #tpu.memory_space<vmem>>, vector<128x32xf32>
    %c0_1 = arith.constant 0 : index
    %c0_2 = arith.constant 0 : index
    %1 = vector.load %arg2[%c0_1, %c0_2] : memref<128x32xf32, #tpu.memory_space<vmem>>, vector<128x32xf32>
    %2 = arith.addf %0, %1 : vector<128x32xf32>
    %3 = arith.truncf %0 : vector<128x32xf32> to vector<128x32xbf16>
    %4 = arith.truncf %2 : vector<128x32xf32> to vector<128x32xbf16>
    %c0_3 = arith.constant 0 : index
    %c0_4 = arith.constant 0 : index
    %5 = vector.load %arg3[%c0_3, %c0_4] : memref<32x32xbf16, #tpu.memory_space<vmem>>, vector<32x32xbf16>
    %cst = arith.constant dense<0.000000e+00> : vector<128x32xf32>
    %6 = tpu.matmul %3, %5, %cst {dimension_numbers = #tpu.dot_dimension_numbers<[1], [0], [0], [1], [0, 0, 1, 1], [], []>} : vector<128x32xbf16>, vector<32x32xbf16>, vector<128x32xf32> -> vector<128x32xf32>
    %c0_5 = arith.constant 0 : index
    %c0_6 = arith.constant 0 : index
    %7 = vector.load %arg4[%c0_5, %c0_6] : memref<1x32xf32, #tpu.memory_space<vmem>>, vector<1x32xf32>
    %8 = vector.broadcast %7 : vector<1x32xf32> to vector<128x32xf32>
    %9 = arith.addf %6, %8 : vector<128x32xf32>
    %c0_7 = arith.constant 0 : index
    %c0_8 = arith.constant 0 : index
    %10 = vector.load %arg5[%c0_7, %c0_8] : memref<32x32xbf16, #tpu.memory_space<vmem>>, vector<32x32xbf16>
    %cst_9 = arith.constant dense<0.000000e+00> : vector<128x32xf32>
    %11 = tpu.matmul %4, %10, %cst_9 {dimension_numbers = #tpu.dot_dimension_numbers<[1], [0], [0], [1], [0, 0, 1, 1], [], []>} : vector<128x32xbf16>, vector<32x32xbf16>, vector<128x32xf32> -> vector<128x32xf32>
    %c0_10 = arith.constant 0 : index
    %c0_11 = arith.constant 0 : index
    %12 = vector.load %arg6[%c0_10, %c0_11] : memref<1x32xf32, #tpu.memory_space<vmem>>, vector<1x32xf32>
    %13 = vector.broadcast %12 : vector<1x32xf32> to vector<128x32xf32>
    %14 = arith.addf %11, %13 : vector<128x32xf32>
    %15 = arith.truncf %9 : vector<128x32xf32> to vector<128x32xbf16>
    %16 = vector.shape_cast %15 : vector<128x32xbf16> to vector<1x128x32xbf16>
    %17 = arith.truncf %14 : vector<128x32xf32> to vector<128x32xbf16>
    %18 = vector.shape_cast %17 : vector<128x32xbf16> to vector<1x128x32xbf16>
    "tpu.trace_start"() <{level = 10 : i32, message = "bih,bjh->bij"}> : () -> ()
    %cst_12 = arith.constant dense<0.000000e+00> : vector<1x128x128xf32>
    %19 = tpu.matmul %16, %18, %cst_12 {dimension_numbers = #tpu.dot_dimension_numbers<[2], [2], [1], [1], [0, 0, 0, 1, 1, 1], [0], [0]>} : vector<1x128x32xbf16>, vector<1x128x32xbf16>, vector<1x128x128xf32> -> vector<1x128x128xf32>
    "tpu.trace_stop"() : () -> ()
    %c0_13 = arith.constant 0 : index
    %c0_14 = arith.constant 0 : index
    %c0_15 = arith.constant 0 : index
    %20 = vector.load %arg7[%c0_13, %c0_14, %c0_15] : memref<1x128x128xf32, #tpu.memory_space<vmem>>, vector<1x128x128xf32>
    tpu.vector_store %arg7[%c0_13, %c0_14, %c0_15], %19 {strides = array<i32>} : memref<1x128x128xf32, #tpu.memory_space<vmem>>, vector<1x128x128xf32>,
    return
  }
  func.func @transform_0(%arg0: i32) -> (i32, i32) {
    %c0_i32 = arith.constant 0 : i32
    %c0_i32_0 = arith.constant 0 : i32
    return %arg0, %c0_i32 : i32, i32
  }
  func.func @transform_1(%arg0: i32) -> (i32, i32) {
    %c0_i32 = arith.constant 0 : i32
    %c0_i32_0 = arith.constant 0 : i32
    return %arg0, %c0_i32 : i32, i32
  }
  func.func @transform_2(%arg0: i32) -> (i32, i32) {
    %c0_i32 = arith.constant 0 : i32
    %c0_i32_0 = arith.constant 0 : i32
    %c0_i32_1 = arith.constant 0 : i32
    return %c0_i32, %c0_i32_0 : i32, i32
  }
  func.func @transform_3(%arg0: i32) -> (i32, i32) {
    %c0_i32 = arith.constant 0 : i32
    %c0_i32_0 = arith.constant 0 : i32
    %c0_i32_1 = arith.constant 0 : i32
    return %c0_i32, %c0_i32_0 : i32, i32
  }
  func.func @transform_4(%arg0: i32) -> (i32, i32) {
    %c0_i32 = arith.constant 0 : i32
    %c0_i32_0 = arith.constant 0 : i32
    %c0_i32_1 = arith.constant 0 : i32
    return %c0_i32, %c0_i32_0 : i32, i32
  }
  func.func @transform_5(%arg0: i32) -> (i32, i32) {
    %c0_i32 = arith.constant 0 : i32
    %c0_i32_0 = arith.constant 0 : i32
    %c0_i32_1 = arith.constant 0 : i32
    return %c0_i32, %c0_i32_0 : i32, i32
  }
  func.func @transform_6(%arg0: i32) -> (i32, i32, i32) {
    %c0_i32 = arith.constant 0 : i32
    %c0_i32_0 = arith.constant 0 : i32
    %c0_i32_1 = arith.constant 0 : i32
    return %arg0, %c0_i32, %c0_i32_0 : i32, i32, i32
  }
}

module attributes {stable_mosaic.version = 11 : i64} {
  func.func @_scope_kernel(%arg0: i32, %arg1: memref<128x32xf32, #tpu.memory_space<vmem>>, %arg2: memref<128x32xf32, #tpu.memory_space<vmem>>, %arg3: memref<32x32xbf16, #tpu.memory_space<vmem>>, %arg4: memref<1x32xf32, #tpu.memory_space<vmem>>, %arg5: memref<32x32xbf16, #tpu.memory_space<vmem>>, %arg6: memref<1x32xf32, #tpu.memory_space<vmem>>, %arg7: memref<1x128x128xf32, #tpu.memory_space<vmem>>) attributes {dimension_semantics = [#tpu.dimension_semantics<parallel>], iteration_bounds = array<i64: 2>, scalar_prefetch = 0 : i64, scratch_operands = 0 : i64, tpu.core_type = #tpu.core_type<tc>, window_params = [{transform_indices = @transform_0, window_bounds = array<i64: 128, 32>}, {transform_indices = @transform_1, window_bounds = array<i64: 128, 32>}, {pipeline_mode = #tpu.pipeline_mode<synchronous>, transform_indices = @transform_2, window_bounds = array<i64: 32, 32>}, {pipeline_mode = #tpu.pipeline_mode<synchronous>, transform_indices = @transform_3, window_bounds = array<i64: 1, 32>}, {pipeline_mode = #tpu.pipeline_mode<synchronous>, transform_indices = @transform_4, window_bounds = array<i64: 32, 32>}, {pipeline_mode = #tpu.pipeline_mode<synchronous>, transform_indices = @transform_5, window_bounds = array<i64: 1, 32>}, {transform_indices = @transform_6, window_bounds = array<i64: 1, 128, 128>}]} {
    %c0 = arith.constant 0 : index
    %c0_0 = arith.constant 0 : index
    %0 = vector.load %arg1[%c0, %c0_0] : memref<128x32xf32, #tpu.memory_space<vmem>>, vector<128x32xf32>
    %c0_1 = arith.constant 0 : index
    %c0_2 = arith.constant 0 : index
    %1 = vector.load %arg2[%c0_1, %c0_2] : memref<128x32xf32, #tpu.memory_space<vmem>>, vector<128x32xf32>
    %2 = arith.addf %0, %1 : vector<128x32xf32>
    %3 = arith.truncf %0 : vector<128x32xf32> to vector<128x32xbf16>
    %4 = arith.truncf %2 : vector<128x32xf32> to vector<128x32xbf16>
    %c0_3 = arith.constant 0 : index
    %c0_4 = arith.constant 0 : index
    %5 = vector.load %arg3[%c0_3, %c0_4] : memref<32x32xbf16, #tpu.memory_space<vmem>>, vector<32x32xbf16>
    %cst = arith.constant dense<0.000000e+00> : vector<128x32xf32>
    %6 = tpu.matmul %3, %5, %cst {dimension_numbers = #tpu.dot_dimension_numbers<[1], [0], [0], [1], [0, 0, 1, 1], [], []>} : vector<128x32xbf16>, vector<32x32xbf16>, vector<128x32xf32> -> vector<128x32xf32>
    %c0_5 = arith.constant 0 : index
    %c0_6 = arith.constant 0 : index
    %7 = vector.load %arg4[%c0_5, %c0_6] : memref<1x32xf32, #tpu.memory_space<vmem>>, vector<1x32xf32>
    %8 = vector.broadcast %7 : vector<1x32xf32> to vector<128x32xf32>
    %9 = arith.addf %6, %8 : vector<128x32xf32>
    %c0_7 = arith.constant 0 : index
    %c0_8 = arith.constant 0 : index
    %10 = vector.load %arg5[%c0_7, %c0_8] : memref<32x32xbf16, #tpu.memory_space<vmem>>, vector<32x32xbf16>
    %cst_9 = arith.constant dense<0.000000e+00> : vector<128x32xf32>
    %11 = tpu.matmul %4, %10, %cst_9 {dimension_numbers = #tpu.dot_dimension_numbers<[1], [0], [0], [1], [0, 0, 1, 1], [], []>} : vector<128x32xbf16>, vector<32x32xbf16>, vector<128x32xf32> -> vector<128x32xf32>
    %c0_10 = arith.constant 0 : index
    %c0_11 = arith.constant 0 : index
    %12 = vector.load %arg6[%c0_10, %c0_11] : memref<1x32xf32, #tpu.memory_space<vmem>>, vector<1x32xf32>
    %13 = vector.broadcast %12 : vector<1x32xf32> to vector<128x32xf32>
    %14 = arith.addf %11, %13 : vector<128x32xf32>
    %15 = arith.truncf %9 : vector<128x32xf32> to vector<128x32xbf16>
    %16 = vector.shape_cast %15 : vector<128x32xbf16> to vector<1x128x32xbf16>
    %17 = arith.truncf %14 : vector<128x32xf32> to vector<128x32xbf16>
    %18 = vector.shape_cast %17 : vector<128x32xbf16> to vector<1x128x32xbf16>
    "tpu.trace_start"() <{level = 10 : i32, message = "bih,bjh->bij"}> : () -> ()
    %cst_12 = arith.constant dense<0.000000e+00> : vector<1x128x128xf32>
    %19 = tpu.matmul %16, %18, %cst_12 {dimension_numbers = #tpu.dot_dimension_numbers<[2], [2], [1], [1], [0, 0, 0, 1, 1, 1], [0], [0]>} : vector<1x128x32xbf16>, vector<1x128x32xbf16>, vector<1x128x128xf32> -> vector<1x128x128xf32>
    "tpu.trace_stop"() : () -> ()
    %c0_13 = arith.constant 0 : index
    %c0_14 = arith.constant 0 : index
    %c0_15 = arith.constant 0 : index
    %20 = vector.load %arg7[%c0_13, %c0_14, %c0_15] : memref<1x128x128xf32, #tpu.memory_space<vmem>>, vector<1x128x128xf32>
    tpu.vector_store %arg7[%c0_13, %c0_14, %c0_15], %19 {strides = array<i32>} : memref<1x128x128xf32, #tpu.memory_space<vmem>>, vector<1x128x128xf32>,
    return
  }
  func.func @transform_0(%arg0: i32) -> (i32, i32) {
    %c0_i32 = arith.constant 0 : i32
    %c0_i32_0 = arith.constant 0 : i32
    return %arg0, %c0_i32 : i32, i32
  }
  func.func @transform_1(%arg0: i32) -> (i32, i32) {
    %c0_i32 = arith.constant 0 : i32
    %c0_i32_0 = arith.constant 0 : i32
    return %arg0, %c0_i32 : i32, i32
  }
  func.func @transform_2(%arg0: i32) -> (i32, i32) {
    %c0_i32 = arith.constant 0 : i32
    %c0_i32_0 = arith.constant 0 : i32
    %c0_i32_1 = arith.constant 0 : i32
    return %c0_i32, %c0_i32_0 : i32, i32
  }
  func.func @transform_3(%arg0: i32) -> (i32, i32) {
    %c0_i32 = arith.constant 0 : i32
    %c0_i32_0 = arith.constant 0 : i32
    %c0_i32_1 = arith.constant 0 : i32
    return %c0_i32, %c0_i32_0 : i32, i32
  }
  func.func @transform_4(%arg0: i32) -> (i32, i32) {
    %c0_i32 = arith.constant 0 : i32
    %c0_i32_0 = arith.constant 0 : i32
    %c0_i32_1 = arith.constant 0 : i32
    return %c0_i32, %c0_i32_0 : i32, i32
  }
  func.func @transform_5(%arg0: i32) -> (i32, i32) {
    %c0_i32 = arith.constant 0 : i32
    %c0_i32_0 = arith.constant 0 : i32
    %c0_i32_1 = arith.constant 0 : i32
    return %c0_i32, %c0_i32_0 : i32, i32
  }
  func.func @transform_6(%arg0: i32) -> (i32, i32, i32) {
    %c0_i32 = arith.constant 0 : i32
    %c0_i32_0 = arith.constant 0 : i32
    %c0_i32_1 = arith.constant 0 : i32
    return %arg0, %c0_i32, %c0_i32_0 : i32, i32, i32
  }
}

</mosaic_0001>

<bundles_post_ra>
// kernel: tpu_custom_call.1
= control target key start
LH: loop header
LB: loop body
LE: loop exit
PB: predicated region body
PF: predicated region fallthrough
CT: control target
= control target key end

     0   :  { %11 = vsyncpa [#allocation3], 0  ;;  %s1540_s0 = inlined_call_operand.vmem [shape: f32[256,32], index: 0, kind: input, shape index: {}]   ;;  %s1541_s1 = inlined_call_operand.vmem [shape: f32[256,32], index: 1, kind: input, shape index: {}]   ;;  %s1542_s2 = inlined_call_operand.vmem [shape: bf16[32,32], index: 2, kind: input, shape index: {}]   ;;  %s1543_s3 = inlined_call_operand.vmem [shape: f32[1,32], index: 3, kind: input, shape index: {}]   ;;  %s1544_s4 = inlined_call_operand.vmem [shape: bf16[32,32], index: 4, kind: input, shape index: {}]   ;;  %s1545_s5 = inlined_call_operand.vmem [shape: f32[1,32], index: 5, kind: input, shape index: {}]   ;;  %s1546_s6 = inlined_call_operand.hbm [shape: f32[2,128,128], index: 6, kind: output, shape index: {}]  }
   0x1   :  { %13 = vsyncpa [#allocation3 + $0x1], 0  ;;  %s1223_s21 = smov 0   ;;  %s1225_s22 = smov 0  }
   0x2   :  { %s1227_s23 = smov 0   ;;  %s1229_s24 = smov 0  }
   0x3 LB: > { %s1244_s25 = sadd.s32 4294967295, %s1183_s24   ;;  %s893_s26 = sadd.s32 4294967294, %s1183_s24   ;;  %s1183_s24 = sphi %s1229_s24, %s1552_s24   ;;  %s1179_s23 = sphi %s1227_s23, %s1551_s23   ;;  %s1175_s22 = sphi %s1225_s22, %s1550_s22   ;;  %s1171_s21 = sphi %s1223_s21, %s1549_s21  }
   0x4   : > { %s1248_s27 = sadd.s32 1, %s1183_s24   ;;  %s162_s28 = sadd.s32 1, %s1179_s23 }
   0x5   : > { %s159_s29 = ssub.s32 %s1183_s24, %s1248_s27  ;;  %p172_p0 = scmp.ne.s32.totalorder %s1179_s23, %s1175_s22 }
   0x6   : > { %p160_p1 = scmp.eq.s32.totalorder %s159_s29, 0  ;;  %p173_p2 = scmp.eq.s32.totalorder %s1244_s25, 1 }
   0x7   : > { %p178_p3 = scmp.ne.s32.totalorder %s1175_s22, %s1171_s21  ;;  %p179_p4 = scmp.eq.s32.totalorder %s893_s26, 1 }
   0x8   : > { %s1259_s30 = scalar_select %p160_p1, %s1179_s23, %s162_s28  }
   0x9   : > { %p1261_p5 = por %p173_p2, %p172_p0  ;;  %p1265_p6 = por %p179_p4, %p178_p3 }
   0xa   : > { %p896_p7 = scmp.ge.s32.totalorder %s1183_s24, 1  ;;  %p227_p8 = scmp.lt.s32.totalorder %s1183_s24, 3 }
   0xc   : > { %p228_p9 = pnand %p896_p7, %p227_p8 }
   0xd   : > { %s898_s11 = sshll.u32 (!%p228_p9), %s1244_s25, 4  ;;  %s259_s14 = sand.u32 (!%p228_p9), 1, %s1175_s22  }
   0xe   : > { %231 = sbr.rel (%p228_p9) target bundleno = 539 (0x21b), region = 44  ;;  %p263_p10 = scmp.lt.s32.totalorder (!%p228_p9), %s898_s11, 31 }
   0xf   : > { %s897_s15 = sshll.u32 (!%p228_p9), %s259_s14, 7  ;;  %s937_s17 = sshll.u32 (!%p228_p9), %s1244_s25, 11 }
  0x10   : > { %s1471_s16 = scalar_lea.vmem (!%p228_p9), [#allocation2], %s897_s15  ;;  %s1500_s25 = scalar_lea.sflag (!%p228_p9), [#allocation3], %s259_s14 }
  0x11   : > { %s1185_s29 = smov (!%p228_p9), [#allocation2]  }
  0x13   : > { %v1119_v0 = vld [vmem:[%s1544_s4 + $0x8] sm:$0xff]   ;;  %v1120_v1 = vld [vmem:[%s1544_s4] sm:$0xff]   ;;  %s1554_s11 = smov (!%p263_p10, %s898_s11), 31  ;;  %vm362_vm0 = vcmask 261120  }
  0x14   : > { %994 = vmatprep.subr.bf16.mxu1 %v1119_v0  ;;  %v1121_v2 = vld [vmem:[%s1542_s2 + $0x8] sm:$0xff]   ;;  %v1122_v3 = vld [vmem:[%s1542_s2] sm:$0xff]   ;;  %s899_s18 = sshll.u32 %s1554_s11, 3 }
  0x15   : > { %995 = vmatpush3.bf16.msra.mxu1 %v1119_v0  ;;  %974 = vmatprep.subr.bf16.mxu0 %v1121_v2  ;;  %s1287_s26 = scalar_lea.vmem %s1540_s0, %s899_s18  ;;  %s1292_s9 = scalar_lea.vmem %s1541_s1, %s899_s18 }
  0x16   : > { %996 = vmatprep.subr.bf16.mxu1 %v1120_v1  ;;  %975 = vmatpush3.bf16.msra.mxu0 %v1121_v2  ;;  %v275_v4 = vld [vmem:[%s1287_s26] sm:$0xff]  ;;  %v276_v5 = vld [vmem:[%s1287_s26 + $0x8] sm:$0xff]  ;;  %v277_v9 = vld [vmem:[%s1287_s26 + $0x10] sm:$0xff]  ;;  %s819_s18 = sshll.u32 %s1471_s16, 4  ;;  %s1492_s18 = int_to_ptr.vmem [resolvable:$true] %s819_s18 }
  0x17   : > { %976 = vmatprep.subr.bf16.mxu0 %v1122_v3  ;;  %v291_v6 = vld [vmem:[%s1292_s9] sm:$0xff]  ;;  %v292_v7 = vld [vmem:[%s1292_s9 + $0x8] sm:$0xff]  ;;  %v278_v10 = vld [vmem:[%s1287_s26 + $0x18] sm:$0xff]  ;;  %v323_v11 = vpack.c.bf16 %v276_v5, %v275_v4  ;;  %s1123_s28 = scalar_lea.vmem %s1492_s18, 2048 }
  0x18   : > { %v307_v8 = vadd.f32 %v291_v6, %v275_v4  ;;  %v308_v12 = vadd.f32 %v292_v7, %v276_v5  ;;  %v293_v13 = vld [vmem:[%s1292_s9 + $0x10] sm:$0xff]  ;;  %v294_v14 = vld [vmem:[%s1292_s9 + $0x18] sm:$0xff]  ;;  %v279_v15 = vld [vmem:[%s1287_s26 + $0x20] sm:$0xff]  ;;  %v324_v16 = vpack.c.bf16 %v278_v10, %v277_v9  ;;  %p1124_p11 = scmp.ne.s32.totalorder %s1492_s18, %s1123_s28 }
  0x19   : > { %997 = vmatpush3.bf16.msra.mxu1 %v1120_v1  ;;  %v309_v17 = vadd.f32 %v293_v13, %v277_v9  ;;  %v310_v18 = vadd.f32 %v294_v14, %v278_v10  ;;  %v280_v19 = vld [vmem:[%s1287_s26 + $0x28] sm:$0xff]  ;;  %v295_v20 = vld [vmem:[%s1292_s9 + $0x20] sm:$0xff]  ;;  %978 = vmatprep.mubr.msk.bf16.mxu0 %vm362_vm0, %v323_v11  ;;  %v281_v25 = vld [vmem:[%s1287_s26 + $0x30] sm:$0xff] }
  0x1a   : > { %977 = vmatpush3.bf16.msra.mxu0 %v1122_v3  ;;  %v296_v21 = vld [vmem:[%s1292_s9 + $0x28] sm:$0xff]  ;;  %v331_v22 = vpack.c.bf16 %v308_v12, %v307_v8  ;;  %v311_v23 = vadd.f32 %v295_v20, %v279_v15  ;;  %v282_v26 = vld [vmem:[%s1287_s26 + $0x38] sm:$0xff]  ;;  %v297_v27 = vld [vmem:[%s1292_s9 + $0x30] sm:$0xff]  ;;  %v325_v28 = vpack.c.bf16 %v280_v19, %v279_v15  ;;  %p1125_p12 = pnand %p1124_p11, %p1261_p5 }
  0x1b   : > { %v312_v24 = vadd.f32 %v296_v21, %v280_v19  ;;  %v332_v29 = vpack.c.bf16 %v310_v18, %v309_v17  ;;  %v298_v30 = vld [vmem:[%s1292_s9 + $0x38] sm:$0xff]  ;;  %v283_v31 = vld [vmem:[%s1287_s26 + $0x40] sm:$0xff]  ;;  %v284_v32 = vld [vmem:[%s1287_s26 + $0x48] sm:$0xff]  ;;  %v313_v36 = vadd.f32 %v297_v27, %v281_v25  ;;  %v326_v40 = vpack.c.bf16 %v282_v26, %v281_v25 }
  0x1c   : > { %998 = vmatprep.mubr.msk.bf16.mxu1 %vm362_vm0, %v331_v22  ;;  %v299_v34 = vld [vmem:[%s1292_s9 + $0x40] sm:$0xff]  ;;  %v300_v35 = vld [vmem:[%s1292_s9 + $0x48] sm:$0xff]  ;;  %v314_v37 = vadd.f32 %v298_v30, %v282_v26  ;;  %v327_v41 = vpack.c.bf16 %v284_v32, %v283_v31  ;;  %v285_v43 = vld [vmem:[%s1287_s26 + $0x50] sm:$0xff]  ;;  %p1126_p13 = pneg %p1125_p12 }
  0x1d   : > { %979 = vmatmul.mubr.msk.bf16.vlgmr.msra.gmra.mxu0 %vm362_vm0, %v324_v16  ;;  %v333_v33 = vpack.c.bf16 %v312_v24, %v311_v23  ;;  %999 = vmatmul.mubr.msk.bf16.vlgmr.msra.gmra.mxu1 %vm362_vm0, %v332_v29  ;;  %v315_v38 = vadd.f32 %v299_v34, %v283_v31  ;;  %v316_v39 = vadd.f32 %v300_v35, %v284_v32  ;;  %v286_v44 = vld [vmem:[%s1287_s26 + $0x58] sm:$0xff]  ;;  %v301_v46 = vld [vmem:[%s1292_s9 + $0x50] sm:$0xff]  ;;  %v287_v48 = vld [vmem:[%s1287_s26 + $0x60] sm:$0xff] }
  0x1e   : > { %982 = vmatprep.mubr.msk.bf16.mxu0 %vm362_vm0, %v325_v28  ;;  %v334_v42 = vpack.c.bf16 %v314_v37, %v313_v36  ;;  %v302_v47 = vld [vmem:[%s1292_s9 + $0x58] sm:$0xff]  ;;  %v288_v49 = vld [vmem:[%s1287_s26 + $0x68] sm:$0xff]  ;;  %v303_v50 = vld [vmem:[%s1292_s9 + $0x60] sm:$0xff]  ;;  %v317_v52 = vadd.f32 %v301_v46, %v285_v43  ;;  %v328_v56 = vpack.c.bf16 %v286_v44, %v285_v43 }
  0x1f   : > { %1002 = vmatprep.mubr.msk.bf16.mxu1 %vm362_vm0, %v333_v33  ;;  %v335_v45 = vpack.c.bf16 %v316_v39, %v315_v38  ;;  %v304_v51 = vld [vmem:[%s1292_s9 + $0x68] sm:$0xff]  ;;  %v318_v53 = vadd.f32 %v302_v47, %v286_v44  ;;  %v319_v54 = vadd.f32 %v303_v50, %v287_v48  ;;  %v329_v57 = vpack.c.bf16 %v288_v49, %v287_v48  ;;  %v289_v59 = vld [vmem:[%s1287_s26 + $0x70] sm:$0xff]  ;;  %v290_v61 = vld [vmem:[%s1287_s26 + $0x78] sm:$0xff]  ;;  %s1490_s26 = scalar_lea.hbm %s1546_s6, %s937_s17 }
  0x20   : > { %v320_v55 = vadd.f32 %v304_v51, %v288_v49  ;;  %v305_v62 = vld [vmem:[%s1292_s9 + $0x70] sm:$0xff]  ;;  %v306_v63 = vld [vmem:[%s1292_s9 + $0x78] sm:$0xff]  ;;  %v330_v2 = vpack.c.bf16 %v290_v61, %v289_v59  ;;  %v1345_v4 = vld [vmem:[%s1543_s3] ss:$0 sm:$0xff]  ;;  %s1127_s9 = sshll.u32 %s1185_s29, 4  ;;  %s1128_s9 = int_to_ptr.vmem [resolvable:$false] %s1127_s9 }
  0x21   : > { %v336_v58 = vpack.c.bf16 %v318_v53, %v317_v52  ;;  %v321_v0 = vadd.f32 %v305_v62, %v289_v59  ;;  %v322_v1 = vadd.f32 %v306_v63, %v290_v61  ;;  %v1353_v9 = vld [vmem:[%s1545_s5] ss:$0 sm:$0xff]  ;;  %s1129_s10 = scalar_lea.vmem %s1128_s9, 4096  ;;  %p1130_p0 = scmp.lt.s32.totalorder %s1492_s18, %s1128_s9 }
  0x22   : > { %v337_v60 = vpack.c.bf16 %v320_v55, %v319_v54  ;;  %p1131_p1 = scmp.lt.s32.totalorder %s1129_s10, %s1123_s28 }
  0x23   : > { %v338_v3 = vpack.c.bf16 %v322_v1, %v321_v0 }
  0x24   : > { %p1132_p2 = por %p1131_p1, %p1130_p0 }
  0x25   : > { %983 = vmatmul.mubr.msk.bf16.gmra.mxu0 %vm362_vm0, %v326_v40  ;;  %1003 = vmatmul.mubr.msk.bf16.gmra.mxu1 %vm362_vm0, %v334_v42 }
  0x26   : > { %986 = vmatprep.mubr.msk.bf16.mxu0 %vm362_vm0, %v327_v41  ;;  %1006 = vmatprep.mubr.msk.bf16.mxu1 %vm362_vm0, %v335_v45  ;;  %p1133_p3 = pnand %p1132_p2, %p1126_p13 }
  0x2d   : > { %987 = vmatmul.mubr.msk.bf16.gmra.mxu0 %vm362_vm0, %v328_v56  ;;  %1007 = vmatmul.mubr.msk.bf16.gmra.mxu1 %vm362_vm0, %v336_v58 }
  0x2e   : > { %990 = vmatprep.mubr.msk.bf16.mxu0 %vm362_vm0, %v329_v57  ;;  %1010 = vmatprep.mubr.msk.bf16.mxu1 %vm362_vm0, %v337_v60 }
  0x35   : > { %991 = vmatmul.mubr.msk.bf16.gmra.mxu0 %vm362_vm0, %v330_v2  ;;  %1011 = vmatmul.mubr.msk.bf16.gmra.mxu1 %vm362_vm0, %v338_v3 }
  0xdd   : > { %v980_v5 = vpop.f32.mrf.mxu0  ;;  %v1000_v7 = vpop.f32.mrf.mxu1 }
  0xde   : > { %v1348_v6 = vadd.f32 %v980_v5, %v1345_v4  ;;  %v574_v16 = vadd.f32 %v1000_v7, %v1353_v9 }
  0xdf   : > { %v421_v8 = vpop.f32.mrf.mxu0  ;;  %v565_v10 = vpop.f32.mrf.mxu1 }
  0xe0   : > { %v422_v12 = vadd.f32 %v1345_v4, %v421_v8  ;;  %v566_v20 = vadd.f32 %v1353_v9, %v565_v10 }
  0xe1   : > { %v981_v11 = vpop.f32.mrf.mxu0  ;;  %v1001_v14 = vpop.f32.mrf.mxu1 }
  0xe2   : > { %v1357_v13 = vadd.f32 %v981_v11, %v1345_v4  ;;  %v577_v17 = vadd.f32 %v1001_v14, %v1353_v9 }
  0xe3   : > { %v424_v15 = vpop.f32.mrf.mxu0  ;;  %v568_v21 = vpop.f32.mrf.mxu1 }
  0xe4   : > { %v629_v18 = vpack.c.bf16 %v1357_v13, %v1348_v6  ;;  %v425_v19 = vadd.f32 %v1345_v4, %v424_v15  ;;  %v1365_v23 = vpack.c.bf16 %v577_v17, %v574_v16  ;;  %v569_v24 = vadd.f32 %v1353_v9, %v568_v21 }
  0xe5   : > { %v984_v22 = vpop.f32.mrf.mxu0  ;;  %v1371_v27 = vpop.f32.mrf.mxu1 }
  0xe6   : > { %v628_v25 = vpack.c.bf16 %v425_v19, %v422_v12  ;;  %v1369_v26 = vadd.f32 %v984_v22, %v1345_v4  ;;  %v1373_v29 = vpack.c.bf16 %v569_v24, %v566_v20  ;;  %v590_v14 = vadd.f32 %v1371_v27, %v1353_v9 }
  0xe7   : > { %v437_v28 = vpop.f32.mrf.mxu0  ;;  %v1379_v31 = vpop.f32.mrf.mxu1 }
  0xe8   : > { %v1376_v30 = vadd.f32 %v1345_v4, %v437_v28  ;;  %1030 = vmatprep.mubr.msk.bf16.mxu0 %vm362_vm0, %v628_v25  ;;  %v582_v19 = vadd.f32 %v1353_v9, %v1379_v31  ;;  %v672_v25 = vsel %vm362_vm0, %v1365_v23, 0  ;;  %v669_v31 = vsel %vm362_vm0, %v1373_v29, 0 }
  0xe9   : > { %v985_v32 = vpop.f32.mrf.mxu0  ;;  %v1005_v34 = vpop.f32.mrf.mxu1 }
  0xea   : > { %v1382_v33 = vadd.f32 %v985_v32, %v1345_v4  ;;  %v593_v12 = vadd.f32 %v1005_v34, %v1353_v9 }
  0xeb   : > { %v440_v35 = vpop.f32.mrf.mxu0  ;;  %v584_v38 = vpop.f32.mrf.mxu1 }
  0xec   : > { %v631_v36 = vpack.c.bf16 %v1382_v33, %v1369_v26  ;;  %v1387_v37 = vadd.f32 %v1345_v4, %v440_v35  ;;  %v639_v15 = vpack.c.bf16 %v593_v12, %v590_v14  ;;  %v585_v17 = vadd.f32 %v1353_v9, %v584_v38 }
  0xed   : > { %v988_v39 = vpop.f32.mrf.mxu0  ;;  %v1008_v42 = vpop.f32.mrf.mxu1 }
  0xee   : > { %v630_v40 = vpack.c.bf16 %v1387_v37, %v1376_v30  ;;  %v1392_v41 = vadd.f32 %v988_v39, %v1345_v4  ;;  %v606_v2 = vadd.f32 %v1008_v42, %v1353_v9  ;;  %v638_v20 = vpack.c.bf16 %v585_v17, %v582_v19 }
  0xef   : > { %v453_v43 = vpop.f32.mrf.mxu0  ;;  %v597_v44 = vpop.f32.mrf.mxu1  ;;  %v678_v21 = vsel %vm362_vm0, %v639_v15, 0 }
  0xf0   : > { %v454_v46 = vadd.f32 %v1345_v4, %v453_v43  ;;  %v598_v8 = vadd.f32 %v1353_v9, %v597_v44  ;;  %v675_v22 = vsel %vm362_vm0, %v638_v20, 0 }
  0xf1   : > { %v989_v45 = vpop.f32.mrf.mxu0  ;;  %v1009_v48 = vpop.f32.mrf.mxu1 }
  0xf2   : > { %v1396_v47 = vadd.f32 %v989_v45, %v1345_v4  ;;  %v609_v1 = vadd.f32 %v1009_v48, %v1353_v9 }
  0xf3   : > { %v456_v49 = vpop.f32.mrf.mxu0  ;;  %v600_v52 = vpop.f32.mrf.mxu1 }
  0xf4   : > { %v633_v50 = vpack.c.bf16 %v1396_v47, %v1392_v41  ;;  %v457_v51 = vadd.f32 %v1345_v4, %v456_v49  ;;  %v641_v3 = vpack.c.bf16 %v609_v1, %v606_v2  ;;  %v601_v7 = vadd.f32 %v1353_v9, %v600_v52 }
  0xf5   : > { %v1012_v54 = vpop.f32.mrf.mxu1 }
  0xf6   : > { %v632_v53 = vpack.c.bf16 %v457_v51, %v454_v46  ;;  %v622_v57 = vadd.f32 %v1012_v54, %v1353_v9  ;;  %v640_v10 = vpack.c.bf16 %v601_v7, %v598_v8  ;;  %v684_v11 = vsel %vm362_vm0, %v641_v3, 0 }
  0xf7   : > { %v613_v55 = vpop.f32.mrf.mxu1 }
  0xf8   : > { %1038 = vmatprep.mubr.msk.bf16.mxu1 %vm362_vm0, %v632_v53  ;;  %v614_v60 = vadd.f32 %v1353_v9, %v613_v55  ;;  %v681_v16 = vsel %vm362_vm0, %v640_v10, 0 }
  0xf9   : > { %v1013_v56 = vpop.f32.mrf.mxu1 }
  0xfa   : > { %v625_v58 = vadd.f32 %v1013_v56, %v1353_v9 }
  0xfb   : > { %v616_v59 = vpop.f32.mrf.mxu1 }
  0xfc   : > { %v643_v61 = vpack.c.bf16 %v625_v58, %v622_v57  ;;  %v617_v62 = vadd.f32 %v1353_v9, %v616_v59  ;;  %v992_v9 = vpop.f32.mrf.mxu0 }
  0xfe   : > { %v642_v63 = vpack.c.bf16 %v617_v62, %v614_v60  ;;  %1062 = vmatprep.subr.msk.bf16.mxu0 %vm362_vm0, %v643_v61  ;;  %1063 = vmatprep.subr.msk.bf16.mxu1 %vm362_vm0, %v643_v61  ;;  %v690_v0 = vsel %vm362_vm0, %v643_v61, 0  ;;  %v469_v24 = vpop.f32.mrf.mxu0 }
  0xff   : > { %1015 = vmatpush3.bf16.xpose.msra.mxu0 %v690_v0  ;;  %1054 = vmatpush3.bf16.xpose.msra.mxu1 %v690_v0  ;;  %v470_v32 = vadd.f32 %v1345_v4, %v469_v24 }
 0x100   : > { %1064 = vmatprep.subr.msk.bf16.mxu0 %vm362_vm0, %v642_v63  ;;  %1065 = vmatprep.subr.msk.bf16.mxu1 %vm362_vm0, %v642_v63  ;;  %v687_v5 = vsel %vm362_vm0, %v642_v63, 0  ;;  %v993_v27 = vpop.f32.mrf.mxu0 }
 0x101   : > { %v481_v35 = vadd.f32 %v993_v27, %v1345_v4 }
 0x102   : > { %v472_v28 = vpop.f32.mrf.mxu0 }
 0x107   : > { %1017 = vmatpush3.bf16.xpose.msra.mxu0 %v687_v5  ;;  %1055 = vmatpush3.bf16.xpose.msra.mxu1 %v687_v5 }
 0x108   : > { %1066 = vmatprep.subr.msk.bf16.mxu0 %vm362_vm0, %v641_v3  ;;  %1067 = vmatprep.subr.msk.bf16.mxu1 %vm362_vm0, %v641_v3 }
 0x10f   : > { %1019 = vmatpush3.bf16.xpose.msra.mxu0 %v684_v11  ;;  %1056 = vmatpush3.bf16.xpose.msra.mxu1 %v684_v11 }
 0x110   : > { %1068 = vmatprep.subr.msk.bf16.mxu0 %vm362_vm0, %v640_v10  ;;  %1069 = vmatprep.subr.msk.bf16.mxu1 %vm362_vm0, %v640_v10 }
 0x117   : > { %1021 = vmatpush3.bf16.xpose.msra.mxu0 %v681_v16  ;;  %1057 = vmatpush3.bf16.xpose.msra.mxu1 %v681_v16 }
 0x118   : > { %1070 = vmatprep.subr.msk.bf16.mxu0 %vm362_vm0, %v639_v15  ;;  %1071 = vmatprep.subr.msk.bf16.mxu1 %vm362_vm0, %v639_v15 }
 0x11f   : > { %1023 = vmatpush3.bf16.xpose.msra.mxu0 %v678_v21  ;;  %1058 = vmatpush3.bf16.xpose.msra.mxu1 %v678_v21 }
 0x120   : > { %1072 = vmatprep.subr.msk.bf16.mxu0 %vm362_vm0, %v638_v20  ;;  %1073 = vmatprep.subr.msk.bf16.mxu1 %vm362_vm0, %v638_v20 }
 0x127   : > { %1025 = vmatpush3.bf16.xpose.msra.mxu0 %v675_v22  ;;  %1059 = vmatpush3.bf16.xpose.msra.mxu1 %v675_v22 }
 0x128   : > { %1074 = vmatprep.subr.msk.bf16.mxu0 %vm362_vm0, %v1365_v23  ;;  %1075 = vmatprep.subr.msk.bf16.mxu1 %vm362_vm0, %v1365_v23  ;;  %v473_v23 = vadd.f32 %v1345_v4, %v472_v28 }
 0x12a   : > { %v634_v34 = vpack.c.bf16 %v473_v23, %v470_v32 }
 0x12f   : > { %1027 = vmatpush3.bf16.xpose.msra.mxu0 %v672_v25  ;;  %1060 = vmatpush3.bf16.xpose.msra.mxu1 %v672_v25 }
 0x130   : > { %1076 = vmatprep.subr.msk.bf16.mxu0 %vm362_vm0, %v1373_v29  ;;  %1077 = vmatprep.subr.msk.bf16.mxu1 %vm362_vm0, %v1373_v29  ;;  %v478_v29 = vadd.f32 %v992_v9, %v1345_v4 }
 0x132   : > { %v635_v38 = vpack.c.bf16 %v481_v35, %v478_v29 }
 0x137   : > { %1029 = vmatpush3.bf16.xpose.msra.mxu0 %v669_v31  ;;  %1061 = vmatpush3.bf16.xpose.msra.mxu1 %v669_v31 }
 0x13e   : > { %1031 = vmatmul.mubr.msk.bf16.vlgmr.msra.gmra.mxu0 %vm362_vm0, %v629_v18  ;;  %1039 = vmatmul.mubr.msk.bf16.vlgmr.msra.gmra.mxu1 %vm362_vm0, %v633_v50 }
 0x13f   : > { %1034 = vmatprep.mubr.msk.bf16.mxu0 %vm362_vm0, %v630_v40  ;;  %1042 = vmatprep.mubr.msk.bf16.mxu1 %vm362_vm0, %v634_v34 }
 0x146   : > { %1035 = vmatmul.mubr.msk.bf16.gmra.mxu0 %vm362_vm0, %v631_v36  ;;  %1043 = vmatmul.mubr.msk.bf16.gmra.mxu1 %vm362_vm0, %v635_v38 }
 0x1fe   : > { %v1032_v6 = vpop.f32.mrf.mxu0  ;;  %v1040_v13 = vpop.f32.mrf.mxu1 }
 0x1ff   : > { %791 = vst [vmem:[%s1471_s16 + $0x10] sm:$0xff] %v1032_v6  ;;  %799 = vst [vmem:[%s1471_s16 + $0x50] sm:$0xff] %v1040_v13 }
 0x200   : > { %v726_v4 = vpop.f32.mrf.mxu0  ;;  %v758_v18 = vpop.f32.mrf.mxu1 }
 0x201   : > { %789 = vst [vmem:[%s1471_s16] sm:$0xff] %v726_v4  ;;  %797 = vst [vmem:[%s1471_s16 + $0x40] sm:$0xff] %v758_v18 }
 0x202   : > { %v1033_v26 = vpop.f32.mrf.mxu0  ;;  %v1041_v30 = vpop.f32.mrf.mxu1 }
 0x203   : > { %792 = vst [vmem:[%s1471_s16 + $0x18] sm:$0xff] %v1033_v26  ;;  %800 = vst [vmem:[%s1471_s16 + $0x58] sm:$0xff] %v1041_v30 }
 0x204   : > { %v729_v33 = vpop.f32.mrf.mxu0  ;;  %v761_v36 = vpop.f32.mrf.mxu1 }
 0x205   : > { %790 = vst [vmem:[%s1471_s16 + $0x8] sm:$0xff] %v729_v33  ;;  %798 = vst [vmem:[%s1471_s16 + $0x48] sm:$0xff] %v761_v36 }
 0x206   : > { %v1036_v37 = vpop.f32.mrf.mxu0  ;;  %v1044_v39 = vpop.f32.mrf.mxu1 }
 0x207   : > { %795 = vst [vmem:[%s1471_s16 + $0x30] sm:$0xff] %v1036_v37  ;;  %803 = vst [vmem:[%s1471_s16 + $0x70] sm:$0xff] %v1044_v39 }
 0x208   : > { %v742_v40 = vpop.f32.mrf.mxu0  ;;  %v774_v41 = vpop.f32.mrf.mxu1 }
 0x209   : > { %793 = vst [vmem:[%s1471_s16 + $0x20] sm:$0xff] %v742_v40  ;;  %801 = vst [vmem:[%s1471_s16 + $0x60] sm:$0xff] %v774_v41 }
 0x20a   : > { %v1037_v42 = vpop.f32.mrf.mxu0  ;;  %v1045_v43 = vpop.f32.mrf.mxu1 }
 0x20b   : > { %796 = vst [vmem:[%s1471_s16 + $0x38] sm:$0xff] %v1037_v42  ;;  %804 = vst [vmem:[%s1471_s16 + $0x78] sm:$0xff] %v1045_v43 }
 0x20c   : > { %v745_v44 = vpop.f32.mrf.mxu0  ;;  %v777_v45 = vpop.f32.mrf.mxu1 }
 0x20d   : > { %794 = vst [vmem:[%s1471_s16 + $0x28] sm:$0xff] %v745_v44  ;;  %802 = vst [vmem:[%s1471_s16 + $0x68] sm:$0xff] %v777_v45 }
 0x20e   : > { %1136 = shalt.err (!%p1133_p3)
}
 0x20f   : > { %s1137_s11 = scalar_lea.hbm %s1490_s26, 2048  ;;  %s1141_s14 = scalar_lea.hbm %s1546_s6, 4096 }
 0x210   : > { %p1138_p4 = scmp.ne.s32.totalorder %s1490_s26, %s1137_s11  ;;  %p1142_p9 = scmp.lt.s32.totalorder %s1490_s26, %s1546_s6 }
 0x211   : > { %p1143_p10 = scmp.lt.s32.totalorder %s1141_s14, %s1137_s11 }
 0x212   : > { %p1139_p7 = pnand %p1138_p4, %p1261_p5 }
 0x213   : > { %p1144_p11 = por %p1143_p10, %p1142_p9 }
 0x214   : > { %p1140_p8 = pneg %p1139_p7 }
 0x216   : > { %p1145_p12 = pnand %p1144_p11, %p1140_p8 }
 0x218   : > { %1148 = shalt.err (!%p1145_p12)
}
 0x219   : > { %s1186_s17 = smov 128   ;;  %s1187_s19 = smov 8  }
 0x21a   : > { %1078 = dma.vmem_to_hbm [thread:$0]  (%p1261_p5), %s1492_s18, 2048, %s1490_s26, %s1500_s25, %s1186_s17, %s1186_s17, %s1187_s19  }
 0x21b PF: > { %p1084_p13 = scmp.ge.s32.totalorder %s1183_s24, 2  ;;  %s834_s20 = sand.u32 1, %s1171_s21  }
 0x21c   : > { %s835_s28 = scalar_lea.sflag [#allocation3], %s834_s20 }
 0x21d   : > { %p1081_p0 = pnand %p1084_p13, %p1265_p6 }
 0x21f   : > { %p1082_p1 = pneg %p1081_p0 }
 0x221   : > { %1166 = dma.done.wait (%p1082_p1), %s835_s28, 2048  }
 0x222   : > { %1168 = vsyncadd (%p1082_p1), %s835_s28, 4294965248  ;;  %p16_p2 = scmp.ge.s32.totalorder %s1248_s27, 4   ;;  %s1549_s21 = smov %s1175_s22 }
 0x223   : > { %s1550_s22 = smov %s1179_s23  ;;  %s1551_s23 = smov %s1259_s30 }
 0x224   : > { %s1552_s24 = smov %s1248_s27  ;;  %18 = sbr.rel (!%p16_p2) target bundleno = 3 (0x3), region = 82 }
 0x229   :  { %840 = vsyncpa [#allocation3], 1 }
 0x22a   :  { %842 = vsyncpa [#allocation3 + $0x1], 1 }

// kernel: tpu_custom_call.1
= control target key start
LH: loop header
LB: loop body
LE: loop exit
PB: predicated region body
PF: predicated region fallthrough
CT: control target
= control target key end

     0   :  { %11 = vsyncpa [#allocation3], 0  ;;  %s1540_s0 = inlined_call_operand.vmem [shape: f32[256,32], index: 0, kind: input, shape index: {}]   ;;  %s1541_s1 = inlined_call_operand.vmem [shape: f32[256,32], index: 1, kind: input, shape index: {}]   ;;  %s1542_s2 = inlined_call_operand.vmem [shape: bf16[32,32], index: 2, kind: input, shape index: {}]   ;;  %s1543_s3 = inlined_call_operand.vmem [shape: f32[1,32], index: 3, kind: input, shape index: {}]   ;;  %s1544_s4 = inlined_call_operand.vmem [shape: bf16[32,32], index: 4, kind: input, shape index: {}]   ;;  %s1545_s5 = inlined_call_operand.vmem [shape: f32[1,32], index: 5, kind: input, shape index: {}]   ;;  %s1546_s6 = inlined_call_operand.hbm [shape: f32[2,128,128], index: 6, kind: output, shape index: {}]  }
   0x1   :  { %13 = vsyncpa [#allocation3 + $0x1], 0  ;;  %s1223_s21 = smov 0   ;;  %s1225_s22 = smov 0  }
   0x2   :  { %s1227_s23 = smov 0   ;;  %s1229_s24 = smov 0  }
   0x3 LB: > { %s1244_s25 = sadd.s32 4294967295, %s1183_s24   ;;  %s893_s26 = sadd.s32 4294967294, %s1183_s24   ;;  %s1183_s24 = sphi %s1229_s24, %s1552_s24   ;;  %s1179_s23 = sphi %s1227_s23, %s1551_s23   ;;  %s1175_s22 = sphi %s1225_s22, %s1550_s22   ;;  %s1171_s21 = sphi %s1223_s21, %s1549_s21  }
   0x4   : > { %s1248_s27 = sadd.s32 1, %s1183_s24   ;;  %s162_s28 = sadd.s32 1, %s1179_s23 }
   0x5   : > { %s159_s29 = ssub.s32 %s1183_s24, %s1248_s27  ;;  %p172_p0 = scmp.ne.s32.totalorder %s1179_s23, %s1175_s22 }
   0x6   : > { %p160_p1 = scmp.eq.s32.totalorder %s159_s29, 0  ;;  %p173_p2 = scmp.eq.s32.totalorder %s1244_s25, 1 }
   0x7   : > { %p178_p3 = scmp.ne.s32.totalorder %s1175_s22, %s1171_s21  ;;  %p179_p4 = scmp.eq.s32.totalorder %s893_s26, 1 }
   0x8   : > { %s1259_s30 = scalar_select %p160_p1, %s1179_s23, %s162_s28  }
   0x9   : > { %p1261_p5 = por %p173_p2, %p172_p0  ;;  %p1265_p6 = por %p179_p4, %p178_p3 }
   0xa   : > { %p896_p7 = scmp.ge.s32.totalorder %s1183_s24, 1  ;;  %p227_p8 = scmp.lt.s32.totalorder %s1183_s24, 3 }
   0xc   : > { %p228_p9 = pnand %p896_p7, %p227_p8 }
   0xd   : > { %s898_s11 = sshll.u32 (!%p228_p9), %s1244_s25, 4  ;;  %s259_s14 = sand.u32 (!%p228_p9), 1, %s1175_s22  }
   0xe   : > { %231 = sbr.rel (%p228_p9) target bundleno = 539 (0x21b), region = 44  ;;  %p263_p10 = scmp.lt.s32.totalorder (!%p228_p9), %s898_s11, 31 }
   0xf   : > { %s897_s15 = sshll.u32 (!%p228_p9), %s259_s14, 7  ;;  %s937_s17 = sshll.u32 (!%p228_p9), %s1244_s25, 11 }
  0x10   : > { %s1471_s16 = scalar_lea.vmem (!%p228_p9), [#allocation2], %s897_s15  ;;  %s1500_s25 = scalar_lea.sflag (!%p228_p9), [#allocation3], %s259_s14 }
  0x11   : > { %s1185_s29 = smov (!%p228_p9), [#allocation2]  }
  0x13   : > { %v1119_v0 = vld [vmem:[%s1544_s4 + $0x8] sm:$0xff]   ;;  %v1120_v1 = vld [vmem:[%s1544_s4] sm:$0xff]   ;;  %s1554_s11 = smov (!%p263_p10, %s898_s11), 31  ;;  %vm362_vm0 = vcmask 261120  }
  0x14   : > { %994 = vmatprep.subr.bf16.mxu1 %v1119_v0  ;;  %v1121_v2 = vld [vmem:[%s1542_s2 + $0x8] sm:$0xff]   ;;  %v1122_v3 = vld [vmem:[%s1542_s2] sm:$0xff]   ;;  %s899_s18 = sshll.u32 %s1554_s11, 3 }
  0x15   : > { %995 = vmatpush3.bf16.msra.mxu1 %v1119_v0  ;;  %974 = vmatprep.subr.bf16.mxu0 %v1121_v2  ;;  %s1287_s26 = scalar_lea.vmem %s1540_s0, %s899_s18  ;;  %s1292_s9 = scalar_lea.vmem %s1541_s1, %s899_s18 }
  0x16   : > { %996 = vmatprep.subr.bf16.mxu1 %v1120_v1  ;;  %975 = vmatpush3.bf16.msra.mxu0 %v1121_v2  ;;  %v275_v4 = vld [vmem:[%s1287_s26] sm:$0xff]  ;;  %v276_v5 = vld [vmem:[%s1287_s26 + $0x8] sm:$0xff]  ;;  %v277_v9 = vld [vmem:[%s1287_s26 + $0x10] sm:$0xff]  ;;  %s819_s18 = sshll.u32 %s1471_s16, 4  ;;  %s1492_s18 = int_to_ptr.vmem [resolvable:$true] %s819_s18 }
  0x17   : > { %976 = vmatprep.subr.bf16.mxu0 %v1122_v3  ;;  %v291_v6 = vld [vmem:[%s1292_s9] sm:$0xff]  ;;  %v292_v7 = vld [vmem:[%s1292_s9 + $0x8] sm:$0xff]  ;;  %v278_v10 = vld [vmem:[%s1287_s26 + $0x18] sm:$0xff]  ;;  %v323_v11 = vpack.c.bf16 %v276_v5, %v275_v4  ;;  %s1123_s28 = scalar_lea.vmem %s1492_s18, 2048 }
  0x18   : > { %v307_v8 = vadd.f32 %v291_v6, %v275_v4  ;;  %v308_v12 = vadd.f32 %v292_v7, %v276_v5  ;;  %v293_v13 = vld [vmem:[%s1292_s9 + $0x10] sm:$0xff]  ;;  %v294_v14 = vld [vmem:[%s1292_s9 + $0x18] sm:$0xff]  ;;  %v279_v15 = vld [vmem:[%s1287_s26 + $0x20] sm:$0xff]  ;;  %v324_v16 = vpack.c.bf16 %v278_v10, %v277_v9  ;;  %p1124_p11 = scmp.ne.s32.totalorder %s1492_s18, %s1123_s28 }
  0x19   : > { %997 = vmatpush3.bf16.msra.mxu1 %v1120_v1  ;;  %v309_v17 = vadd.f32 %v293_v13, %v277_v9  ;;  %v310_v18 = vadd.f32 %v294_v14, %v278_v10  ;;  %v280_v19 = vld [vmem:[%s1287_s26 + $0x28] sm:$0xff]  ;;  %v295_v20 = vld [vmem:[%s1292_s9 + $0x20] sm:$0xff]  ;;  %978 = vmatprep.mubr.msk.bf16.mxu0 %vm362_vm0, %v323_v11  ;;  %v281_v25 = vld [vmem:[%s1287_s26 + $0x30] sm:$0xff] }
  0x1a   : > { %977 = vmatpush3.bf16.msra.mxu0 %v1122_v3  ;;  %v296_v21 = vld [vmem:[%s1292_s9 + $0x28] sm:$0xff]  ;;  %v331_v22 = vpack.c.bf16 %v308_v12, %v307_v8  ;;  %v311_v23 = vadd.f32 %v295_v20, %v279_v15  ;;  %v282_v26 = vld [vmem:[%s1287_s26 + $0x38] sm:$0xff]  ;;  %v297_v27 = vld [vmem:[%s1292_s9 + $0x30] sm:$0xff]  ;;  %v325_v28 = vpack.c.bf16 %v280_v19, %v279_v15  ;;  %p1125_p12 = pnand %p1124_p11, %p1261_p5 }
  0x1b   : > { %v312_v24 = vadd.f32 %v296_v21, %v280_v19  ;;  %v332_v29 = vpack.c.bf16 %v310_v18, %v309_v17  ;;  %v298_v30 = vld [vmem:[%s1292_s9 + $0x38] sm:$0xff]  ;;  %v283_v31 = vld [vmem:[%s1287_s26 + $0x40] sm:$0xff]  ;;  %v284_v32 = vld [vmem:[%s1287_s26 + $0x48] sm:$0xff]  ;;  %v313_v36 = vadd.f32 %v297_v27, %v281_v25  ;;  %v326_v40 = vpack.c.bf16 %v282_v26, %v281_v25 }
  0x1c   : > { %998 = vmatprep.mubr.msk.bf16.mxu1 %vm362_vm0, %v331_v22  ;;  %v299_v34 = vld [vmem:[%s1292_s9 + $0x40] sm:$0xff]  ;;  %v300_v35 = vld [vmem:[%s1292_s9 + $0x48] sm:$0xff]  ;;  %v314_v37 = vadd.f32 %v298_v30, %v282_v26  ;;  %v327_v41 = vpack.c.bf16 %v284_v32, %v283_v31  ;;  %v285_v43 = vld [vmem:[%s1287_s26 + $0x50] sm:$0xff]  ;;  %p1126_p13 = pneg %p1125_p12 }
  0x1d   : > { %979 = vmatmul.mubr.msk.bf16.vlgmr.msra.gmra.mxu0 %vm362_vm0, %v324_v16  ;;  %v333_v33 = vpack.c.bf16 %v312_v24, %v311_v23  ;;  %999 = vmatmul.mubr.msk.bf16.vlgmr.msra.gmra.mxu1 %vm362_vm0, %v332_v29  ;;  %v315_v38 = vadd.f32 %v299_v34, %v283_v31  ;;  %v316_v39 = vadd.f32 %v300_v35, %v284_v32  ;;  %v286_v44 = vld [vmem:[%s1287_s26 + $0x58] sm:$0xff]  ;;  %v301_v46 = vld [vmem:[%s1292_s9 + $0x50] sm:$0xff]  ;;  %v287_v48 = vld [vmem:[%s1287_s26 + $0x60] sm:$0xff] }
  0x1e   : > { %982 = vmatprep.mubr.msk.bf16.mxu0 %vm362_vm0, %v325_v28  ;;  %v334_v42 = vpack.c.bf16 %v314_v37, %v313_v36  ;;  %v302_v47 = vld [vmem:[%s1292_s9 + $0x58] sm:$0xff]  ;;  %v288_v49 = vld [vmem:[%s1287_s26 + $0x68] sm:$0xff]  ;;  %v303_v50 = vld [vmem:[%s1292_s9 + $0x60] sm:$0xff]  ;;  %v317_v52 = vadd.f32 %v301_v46, %v285_v43  ;;  %v328_v56 = vpack.c.bf16 %v286_v44, %v285_v43 }
  0x1f   : > { %1002 = vmatprep.mubr.msk.bf16.mxu1 %vm362_vm0, %v333_v33  ;;  %v335_v45 = vpack.c.bf16 %v316_v39, %v315_v38  ;;  %v304_v51 = vld [vmem:[%s1292_s9 + $0x68] sm:$0xff]  ;;  %v318_v53 = vadd.f32 %v302_v47, %v286_v44  ;;  %v319_v54 = vadd.f32 %v303_v50, %v287_v48  ;;  %v329_v57 = vpack.c.bf16 %v288_v49, %v287_v48  ;;  %v289_v59 = vld [vmem:[%s1287_s26 + $0x70] sm:$0xff]  ;;  %v290_v61 = vld [vmem:[%s1287_s26 + $0x78] sm:$0xff]  ;;  %s1490_s26 = scalar_lea.hbm %s1546_s6, %s937_s17 }
  0x20   : > { %v320_v55 = vadd.f32 %v304_v51, %v288_v49  ;;  %v305_v62 = vld [vmem:[%s1292_s9 + $0x70] sm:$0xff]  ;;  %v306_v63 = vld [vmem:[%s1292_s9 + $0x78] sm:$0xff]  ;;  %v330_v2 = vpack.c.bf16 %v290_v61, %v289_v59  ;;  %v1345_v4 = vld [vmem:[%s1543_s3] ss:$0 sm:$0xff]  ;;  %s1127_s9 = sshll.u32 %s1185_s29, 4  ;;  %s1128_s9 = int_to_ptr.vmem [resolvable:$false] %s1127_s9 }
  0x21   : > { %v336_v58 = vpack.c.bf16 %v318_v53, %v317_v52  ;;  %v321_v0 = vadd.f32 %v305_v62, %v289_v59  ;;  %v322_v1 = vadd.f32 %v306_v63, %v290_v61  ;;  %v1353_v9 = vld [vmem:[%s1545_s5] ss:$0 sm:$0xff]  ;;  %s1129_s10 = scalar_lea.vmem %s1128_s9, 4096  ;;  %p1130_p0 = scmp.lt.s32.totalorder %s1492_s18, %s1128_s9 }
  0x22   : > { %v337_v60 = vpack.c.bf16 %v320_v55, %v319_v54  ;;  %p1131_p1 = scmp.lt.s32.totalorder %s1129_s10, %s1123_s28 }
  0x23   : > { %v338_v3 = vpack.c.bf16 %v322_v1, %v321_v0 }
  0x24   : > { %p1132_p2 = por %p1131_p1, %p1130_p0 }
  0x25   : > { %983 = vmatmul.mubr.msk.bf16.gmra.mxu0 %vm362_vm0, %v326_v40  ;;  %1003 = vmatmul.mubr.msk.bf16.gmra.mxu1 %vm362_vm0, %v334_v42 }
  0x26   : > { %986 = vmatprep.mubr.msk.bf16.mxu0 %vm362_vm0, %v327_v41  ;;  %1006 = vmatprep.mubr.msk.bf16.mxu1 %vm362_vm0, %v335_v45  ;;  %p1133_p3 = pnand %p1132_p2, %p1126_p13 }
  0x2d   : > { %987 = vmatmul.mubr.msk.bf16.gmra.mxu0 %vm362_vm0, %v328_v56  ;;  %1007 = vmatmul.mubr.msk.bf16.gmra.mxu1 %vm362_vm0, %v336_v58 }
  0x2e   : > { %990 = vmatprep.mubr.msk.bf16.mxu0 %vm362_vm0, %v329_v57  ;;  %1010 = vmatprep.mubr.msk.bf16.mxu1 %vm362_vm0, %v337_v60 }
  0x35   : > { %991 = vmatmul.mubr.msk.bf16.gmra.mxu0 %vm362_vm0, %v330_v2  ;;  %1011 = vmatmul.mubr.msk.bf16.gmra.mxu1 %vm362_vm0, %v338_v3 }
  0xdd   : > { %v980_v5 = vpop.f32.mrf.mxu0  ;;  %v1000_v7 = vpop.f32.mrf.mxu1 }
  0xde   : > { %v1348_v6 = vadd.f32 %v980_v5, %v1345_v4  ;;  %v574_v16 = vadd.f32 %v1000_v7, %v1353_v9 }
  0xdf   : > { %v421_v8 = vpop.f32.mrf.mxu0  ;;  %v565_v10 = vpop.f32.mrf.mxu1 }
  0xe0   : > { %v422_v12 = vadd.f32 %v1345_v4, %v421_v8  ;;  %v566_v20 = vadd.f32 %v1353_v9, %v565_v10 }
  0xe1   : > { %v981_v11 = vpop.f32.mrf.mxu0  ;;  %v1001_v14 = vpop.f32.mrf.mxu1 }
  0xe2   : > { %v1357_v13 = vadd.f32 %v981_v11, %v1345_v4  ;;  %v577_v17 = vadd.f32 %v1001_v14, %v1353_v9 }
  0xe3   : > { %v424_v15 = vpop.f32.mrf.mxu0  ;;  %v568_v21 = vpop.f32.mrf.mxu1 }
  0xe4   : > { %v629_v18 = vpack.c.bf16 %v1357_v13, %v1348_v6  ;;  %v425_v19 = vadd.f32 %v1345_v4, %v424_v15  ;;  %v1365_v23 = vpack.c.bf16 %v577_v17, %v574_v16  ;;  %v569_v24 = vadd.f32 %v1353_v9, %v568_v21 }
  0xe5   : > { %v984_v22 = vpop.f32.mrf.mxu0  ;;  %v1371_v27 = vpop.f32.mrf.mxu1 }
  0xe6   : > { %v628_v25 = vpack.c.bf16 %v425_v19, %v422_v12  ;;  %v1369_v26 = vadd.f32 %v984_v22, %v1345_v4  ;;  %v1373_v29 = vpack.c.bf16 %v569_v24, %v566_v20  ;;  %v590_v14 = vadd.f32 %v1371_v27, %v1353_v9 }
  0xe7   : > { %v437_v28 = vpop.f32.mrf.mxu0  ;;  %v1379_v31 = vpop.f32.mrf.mxu1 }
  0xe8   : > { %v1376_v30 = vadd.f32 %v1345_v4, %v437_v28  ;;  %1030 = vmatprep.mubr.msk.bf16.mxu0 %vm362_vm0, %v628_v25  ;;  %v582_v19 = vadd.f32 %v1353_v9, %v1379_v31  ;;  %v672_v25 = vsel %vm362_vm0, %v1365_v23, 0  ;;  %v669_v31 = vsel %vm362_vm0, %v1373_v29, 0 }
  0xe9   : > { %v985_v32 = vpop.f32.mrf.mxu0  ;;  %v1005_v34 = vpop.f32.mrf.mxu1 }
  0xea   : > { %v1382_v33 = vadd.f32 %v985_v32, %v1345_v4  ;;  %v593_v12 = vadd.f32 %v1005_v34, %v1353_v9 }
  0xeb   : > { %v440_v35 = vpop.f32.mrf.mxu0  ;;  %v584_v38 = vpop.f32.mrf.mxu1 }
  0xec   : > { %v631_v36 = vpack.c.bf16 %v1382_v33, %v1369_v26  ;;  %v1387_v37 = vadd.f32 %v1345_v4, %v440_v35  ;;  %v639_v15 = vpack.c.bf16 %v593_v12, %v590_v14  ;;  %v585_v17 = vadd.f32 %v1353_v9, %v584_v38 }
  0xed   : > { %v988_v39 = vpop.f32.mrf.mxu0  ;;  %v1008_v42 = vpop.f32.mrf.mxu1 }
  0xee   : > { %v630_v40 = vpack.c.bf16 %v1387_v37, %v1376_v30  ;;  %v1392_v41 = vadd.f32 %v988_v39, %v1345_v4  ;;  %v606_v2 = vadd.f32 %v1008_v42, %v1353_v9  ;;  %v638_v20 = vpack.c.bf16 %v585_v17, %v582_v19 }
  0xef   : > { %v453_v43 = vpop.f32.mrf.mxu0  ;;  %v597_v44 = vpop.f32.mrf.mxu1  ;;  %v678_v21 = vsel %vm362_vm0, %v639_v15, 0 }
  0xf0   : > { %v454_v46 = vadd.f32 %v1345_v4, %v453_v43  ;;  %v598_v8 = vadd.f32 %v1353_v9, %v597_v44  ;;  %v675_v22 = vsel %vm362_vm0, %v638_v20, 0 }
  0xf1   : > { %v989_v45 = vpop.f32.mrf.mxu0  ;;  %v1009_v48 = vpop.f32.mrf.mxu1 }
  0xf2   : > { %v1396_v47 = vadd.f32 %v989_v45, %v1345_v4  ;;  %v609_v1 = vadd.f32 %v1009_v48, %v1353_v9 }
  0xf3   : > { %v456_v49 = vpop.f32.mrf.mxu0  ;;  %v600_v52 = vpop.f32.mrf.mxu1 }
  0xf4   : > { %v633_v50 = vpack.c.bf16 %v1396_v47, %v1392_v41  ;;  %v457_v51 = vadd.f32 %v1345_v4, %v456_v49  ;;  %v641_v3 = vpack.c.bf16 %v609_v1, %v606_v2  ;;  %v601_v7 = vadd.f32 %v1353_v9, %v600_v52 }
  0xf5   : > { %v1012_v54 = vpop.f32.mrf.mxu1 }
  0xf6   : > { %v632_v53 = vpack.c.bf16 %v457_v51, %v454_v46  ;;  %v622_v57 = vadd.f32 %v1012_v54, %v1353_v9  ;;  %v640_v10 = vpack.c.bf16 %v601_v7, %v598_v8  ;;  %v684_v11 = vsel %vm362_vm0, %v641_v3, 0 }
  0xf7   : > { %v613_v55 = vpop.f32.mrf.mxu1 }
  0xf8   : > { %1038 = vmatprep.mubr.msk.bf16.mxu1 %vm362_vm0, %v632_v53  ;;  %v614_v60 = vadd.f32 %v1353_v9, %v613_v55  ;;  %v681_v16 = vsel %vm362_vm0, %v640_v10, 0 }
  0xf9   : > { %v1013_v56 = vpop.f32.mrf.mxu1 }
  0xfa   : > { %v625_v58 = vadd.f32 %v1013_v56, %v1353_v9 }
  0xfb   : > { %v616_v59 = vpop.f32.mrf.mxu1 }
  0xfc   : > { %v643_v61 = vpack.c.bf16 %v625_v58, %v622_v57  ;;  %v617_v62 = vadd.f32 %v1353_v9, %v616_v59  ;;  %v992_v9 = vpop.f32.mrf.mxu0 }
  0xfe   : > { %v642_v63 = vpack.c.bf16 %v617_v62, %v614_v60  ;;  %1062 = vmatprep.subr.msk.bf16.mxu0 %vm362_vm0, %v643_v61  ;;  %1063 = vmatprep.subr.msk.bf16.mxu1 %vm362_vm0, %v643_v61  ;;  %v690_v0 = vsel %vm362_vm0, %v643_v61, 0  ;;  %v469_v24 = vpop.f32.mrf.mxu0 }
  0xff   : > { %1015 = vmatpush3.bf16.xpose.msra.mxu0 %v690_v0  ;;  %1054 = vmatpush3.bf16.xpose.msra.mxu1 %v690_v0  ;;  %v470_v32 = vadd.f32 %v1345_v4, %v469_v24 }
 0x100   : > { %1064 = vmatprep.subr.msk.bf16.mxu0 %vm362_vm0, %v642_v63  ;;  %1065 = vmatprep.subr.msk.bf16.mxu1 %vm362_vm0, %v642_v63  ;;  %v687_v5 = vsel %vm362_vm0, %v642_v63, 0  ;;  %v993_v27 = vpop.f32.mrf.mxu0 }
 0x101   : > { %v481_v35 = vadd.f32 %v993_v27, %v1345_v4 }
 0x102   : > { %v472_v28 = vpop.f32.mrf.mxu0 }
 0x107   : > { %1017 = vmatpush3.bf16.xpose.msra.mxu0 %v687_v5  ;;  %1055 = vmatpush3.bf16.xpose.msra.mxu1 %v687_v5 }
 0x108   : > { %1066 = vmatprep.subr.msk.bf16.mxu0 %vm362_vm0, %v641_v3  ;;  %1067 = vmatprep.subr.msk.bf16.mxu1 %vm362_vm0, %v641_v3 }
 0x10f   : > { %1019 = vmatpush3.bf16.xpose.msra.mxu0 %v684_v11  ;;  %1056 = vmatpush3.bf16.xpose.msra.mxu1 %v684_v11 }
 0x110   : > { %1068 = vmatprep.subr.msk.bf16.mxu0 %vm362_vm0, %v640_v10  ;;  %1069 = vmatprep.subr.msk.bf16.mxu1 %vm362_vm0, %v640_v10 }
 0x117   : > { %1021 = vmatpush3.bf16.xpose.msra.mxu0 %v681_v16  ;;  %1057 = vmatpush3.bf16.xpose.msra.mxu1 %v681_v16 }
 0x118   : > { %1070 = vmatprep.subr.msk.bf16.mxu0 %vm362_vm0, %v639_v15  ;;  %1071 = vmatprep.subr.msk.bf16.mxu1 %vm362_vm0, %v639_v15 }
 0x11f   : > { %1023 = vmatpush3.bf16.xpose.msra.mxu0 %v678_v21  ;;  %1058 = vmatpush3.bf16.xpose.msra.mxu1 %v678_v21 }
 0x120   : > { %1072 = vmatprep.subr.msk.bf16.mxu0 %vm362_vm0, %v638_v20  ;;  %1073 = vmatprep.subr.msk.bf16.mxu1 %vm362_vm0, %v638_v20 }
 0x127   : > { %1025 = vmatpush3.bf16.xpose.msra.mxu0 %v675_v22  ;;  %1059 = vmatpush3.bf16.xpose.msra.mxu1 %v675_v22 }
 0x128   : > { %1074 = vmatprep.subr.msk.bf16.mxu0 %vm362_vm0, %v1365_v23  ;;  %1075 = vmatprep.subr.msk.bf16.mxu1 %vm362_vm0, %v1365_v23  ;;  %v473_v23 = vadd.f32 %v1345_v4, %v472_v28 }
 0x12a   : > { %v634_v34 = vpack.c.bf16 %v473_v23, %v470_v32 }
 0x12f   : > { %1027 = vmatpush3.bf16.xpose.msra.mxu0 %v672_v25  ;;  %1060 = vmatpush3.bf16.xpose.msra.mxu1 %v672_v25 }
 0x130   : > { %1076 = vmatprep.subr.msk.bf16.mxu0 %vm362_vm0, %v1373_v29  ;;  %1077 = vmatprep.subr.msk.bf16.mxu1 %vm362_vm0, %v1373_v29  ;;  %v478_v29 = vadd.f32 %v992_v9, %v1345_v4 }
 0x132   : > { %v635_v38 = vpack.c.bf16 %v481_v35, %v478_v29 }
 0x137   : > { %1029 = vmatpush3.bf16.xpose.msra.mxu0 %v669_v31  ;;  %1061 = vmatpush3.bf16.xpose.msra.mxu1 %v669_v31 }
 0x13e   : > { %1031 = vmatmul.mubr.msk.bf16.vlgmr.msra.gmra.mxu0 %vm362_vm0, %v629_v18  ;;  %1039 = vmatmul.mubr.msk.bf16.vlgmr.msra.gmra.mxu1 %vm362_vm0, %v633_v50 }
 0x13f   : > { %1034 = vmatprep.mubr.msk.bf16.mxu0 %vm362_vm0, %v630_v40  ;;  %1042 = vmatprep.mubr.msk.bf16.mxu1 %vm362_vm0, %v634_v34 }
 0x146   : > { %1035 = vmatmul.mubr.msk.bf16.gmra.mxu0 %vm362_vm0, %v631_v36  ;;  %1043 = vmatmul.mubr.msk.bf16.gmra.mxu1 %vm362_vm0, %v635_v38 }
 0x1fe   : > { %v1032_v6 = vpop.f32.mrf.mxu0  ;;  %v1040_v13 = vpop.f32.mrf.mxu1 }
 0x1ff   : > { %791 = vst [vmem:[%s1471_s16 + $0x10] sm:$0xff] %v1032_v6  ;;  %799 = vst [vmem:[%s1471_s16 + $0x50] sm:$0xff] %v1040_v13 }
 0x200   : > { %v726_v4 = vpop.f32.mrf.mxu0  ;;  %v758_v18 = vpop.f32.mrf.mxu1 }
 0x201   : > { %789 = vst [vmem:[%s1471_s16] sm:$0xff] %v726_v4  ;;  %797 = vst [vmem:[%s1471_s16 + $0x40] sm:$0xff] %v758_v18 }
 0x202   : > { %v1033_v26 = vpop.f32.mrf.mxu0  ;;  %v1041_v30 = vpop.f32.mrf.mxu1 }
 0x203   : > { %792 = vst [vmem:[%s1471_s16 + $0x18] sm:$0xff] %v1033_v26  ;;  %800 = vst [vmem:[%s1471_s16 + $0x58] sm:$0xff] %v1041_v30 }
 0x204   : > { %v729_v33 = vpop.f32.mrf.mxu0  ;;  %v761_v36 = vpop.f32.mrf.mxu1 }
 0x205   : > { %790 = vst [vmem:[%s1471_s16 + $0x8] sm:$0xff] %v729_v33  ;;  %798 = vst [vmem:[%s1471_s16 + $0x48] sm:$0xff] %v761_v36 }
 0x206   : > { %v1036_v37 = vpop.f32.mrf.mxu0  ;;  %v1044_v39 = vpop.f32.mrf.mxu1 }
 0x207   : > { %795 = vst [vmem:[%s1471_s16 + $0x30] sm:$0xff] %v1036_v37  ;;  %803 = vst [vmem:[%s1471_s16 + $0x70] sm:$0xff] %v1044_v39 }
 0x208   : > { %v742_v40 = vpop.f32.mrf.mxu0  ;;  %v774_v41 = vpop.f32.mrf.mxu1 }
 0x209   : > { %793 = vst [vmem:[%s1471_s16 + $0x20] sm:$0xff] %v742_v40  ;;  %801 = vst [vmem:[%s1471_s16 + $0x60] sm:$0xff] %v774_v41 }
 0x20a   : > { %v1037_v42 = vpop.f32.mrf.mxu0  ;;  %v1045_v43 = vpop.f32.mrf.mxu1 }
 0x20b   : > { %796 = vst [vmem:[%s1471_s16 + $0x38] sm:$0xff] %v1037_v42  ;;  %804 = vst [vmem:[%s1471_s16 + $0x78] sm:$0xff] %v1045_v43 }
 0x20c   : > { %v745_v44 = vpop.f32.mrf.mxu0  ;;  %v777_v45 = vpop.f32.mrf.mxu1 }
 0x20d   : > { %794 = vst [vmem:[%s1471_s16 + $0x28] sm:$0xff] %v745_v44  ;;  %802 = vst [vmem:[%s1471_s16 + $0x68] sm:$0xff] %v777_v45 }
 0x20e   : > { %1136 = shalt.err (!%p1133_p3)
}
 0x20f   : > { %s1137_s11 = scalar_lea.hbm %s1490_s26, 2048  ;;  %s1141_s14 = scalar_lea.hbm %s1546_s6, 4096 }
 0x210   : > { %p1138_p4 = scmp.ne.s32.totalorder %s1490_s26, %s1137_s11  ;;  %p1142_p9 = scmp.lt.s32.totalorder %s1490_s26, %s1546_s6 }
 0x211   : > { %p1143_p10 = scmp.lt.s32.totalorder %s1141_s14, %s1137_s11 }
 0x212   : > { %p1139_p7 = pnand %p1138_p4, %p1261_p5 }
 0x213   : > { %p1144_p11 = por %p1143_p10, %p1142_p9 }
 0x214   : > { %p1140_p8 = pneg %p1139_p7 }
 0x216   : > { %p1145_p12 = pnand %p1144_p11, %p1140_p8 }
 0x218   : > { %1148 = shalt.err (!%p1145_p12)
}
 0x219   : > { %s1186_s17 = smov 128   ;;  %s1187_s19 = smov 8  }
 0x21a   : > { %1078 = dma.vmem_to_hbm [thread:$0]  (%p1261_p5), %s1492_s18, 2048, %s1490_s26, %s1500_s25, %s1186_s17, %s1186_s17, %s1187_s19  }
 0x21b PF: > { %p1084_p13 = scmp.ge.s32.totalorder %s1183_s24, 2  ;;  %s834_s20 = sand.u32 1, %s1171_s21  }
 0x21c   : > { %s835_s28 = scalar_lea.sflag [#allocation3], %s834_s20 }
 0x21d   : > { %p1081_p0 = pnand %p1084_p13, %p1265_p6 }
 0x21f   : > { %p1082_p1 = pneg %p1081_p0 }
 0x221   : > { %1166 = dma.done.wait (%p1082_p1), %s835_s28, 2048  }
 0x222   : > { %1168 = vsyncadd (%p1082_p1), %s835_s28, 4294965248  ;;  %p16_p2 = scmp.ge.s32.totalorder %s1248_s27, 4   ;;  %s1549_s21 = smov %s1175_s22 }
 0x223   : > { %s1550_s22 = smov %s1179_s23  ;;  %s1551_s23 = smov %s1259_s30 }
 0x224   : > { %s1552_s24 = smov %s1248_s27  ;;  %18 = sbr.rel (!%p16_p2) target bundleno = 3 (0x3), region = 82 }
 0x229   :  { %840 = vsyncpa [#allocation3], 1 }
 0x22a   :  { %842 = vsyncpa [#allocation3 + $0x1], 1 }

</bundles_post_ra>
